<compile_context>
chip_gen: v5e
topology: v5e:2x2
jax: 0.10.0
libtpu: 0.0.40
codegen_flags: <defaults>
</compile_context>

<pallas_src>
import functools

import jax
import jax.numpy as jnp
from jax.experimental import pallas as pl
from jax.experimental.pallas import tpu as pltpu

H1, H2, H3, H4 = 256, 128, 64, 1


def mlp_kernel(x_ref, w1_ref, b1_ref, w2_ref, b2_ref, w3_ref, b3_ref,
               w4t_ref, b4_ref, o_ref):
    cdt = w1_ref.dtype                      # bf16 by default; f32 on the fallback path
    x = x_ref[...].astype(cdt)              # in-kernel cast: no extra HBM pass over x

    # fc1 + ReLU (MXU matmul, f32 accumulation; bias+ReLU epilogue in compute dtype)
    h = jnp.dot(x, w1_ref[...], preferred_element_type=jnp.float32)
    h = jnp.maximum(h.astype(cdt) + b1_ref[...], 0)                  # (TB, 256)

    # fc2 + ReLU
    h = jnp.dot(h, w2_ref[...], preferred_element_type=jnp.float32)
    h = jnp.maximum(h.astype(cdt) + b2_ref[...], 0)                  # (TB, 128)

    # dropout (eval mode -> identity)
    # TODO(synk): training-mode dropout (pltpu.prng_seed + prng_random_bits mask,
    #             scale by 1/(1-p)) if train() parity is ever required.

    # fc3 + ReLU
    h = jnp.dot(h, w3_ref[...], preferred_element_type=jnp.float32)
    h = jnp.maximum(h.astype(cdt) + b3_ref[...], 0)                  # (TB, 64)

    # fc4: contract w4^T (8 zero-padded sublane rows x 64) against h's feature dim.
    # Row 0 of the result is the real output, already lane-dense as (1, TB) -- no
    # (TB, 1) masked stores and no strided HBM writeback.
    out = jax.lax.dot_general(
        w4t_ref[...], h,
        dimension_numbers=(((1,), (1,)), ((), ())),
        preferred_element_type=jnp.float32)                          # (8, TB) f32
    o_ref[...] = (out[0:1, :] + b4_ref[...]).astype(o_ref.dtype)     # (1, TB)


def _cdiv(a, b):
    return -(-a // b)


def _choose_tiling(B, max_tile_b):
    """Balanced batch tiling in 128-row groups (lane-dense output blocks)."""
    m = max(1, _cdiv(B, 128))                 # batch size in 128-row groups
    gpt_max = max(1, max_tile_b // 128)       # max groups per tile
    n = _cdiv(m, gpt_max)
    if m >= 2:
        n = max(n, 2)                         # v7x: give both TensorCores >=1 tile
        if n % 2:
            n += 1                            # even tile count balances the 2-TC split
        n = min(n, m)
    t = _cdiv(m, n)                           # groups per tile (balanced share)
    tile_b = t * 128
    n = _cdiv(m, t)                           # actual #tiles; every tile has valid rows
    return tile_b, n


def prepare_params(params, compute_dtype=jnp.bfloat16):
    """Hoisted, call-once parameter prep: dtype casts + w4^T sublane padding."""
    cdt = compute_dtype
    w4t = jnp.pad(params["w4"].T, ((0, 7), (0, 0)))          # (1,64) -> (8,64), rows 1..7 zero
    return dict(
        w1=params["w1"].astype(cdt), b1=params["b1"].astype(cdt),
        w2=params["w2"].astype(cdt), b2=params["b2"].astype(cdt),
        w3=params["w3"].astype(cdt), b3=params["b3"].astype(cdt),
        w4t=w4t.astype(cdt), b4=params["b4"].astype(jnp.float32),
    )


@functools.partial(jax.jit, static_argnames=("max_tile_b",))
def optimized_nn_forward(x, prepared, *, max_tile_b=4096):
    """x: (B, D_in) float32. prepared: output of prepare_params()."""
    B, D_in = x.shape
    out_dtype = x.dtype

    tile_b, n = _choose_tiling(B, max_tile_b)
    B_pad = n * tile_b
    grid = (n,)

    # Only tiny batches (< 128 rows) need an actual pad; larger ragged batches rely on
    # Pallas's partial boundary-block copies (garbage rows are computed but sliced off).
    if B < tile_b:
        x = jnp.pad(x, ((0, tile_b - B), (0, 0)))

    w1, b1 = prepared["w1"], prepared["b1"]
    w2, b2 = prepared["w2"], prepared["b2"]
    w3, b3 = prepared["w3"], prepared["b3"]
    w4t, b4 = prepared["w4t"], prepared["b4"]

    # Constant-index blocks: DMA'd once, reused for every batch tile.
    full = lambda a: pl.BlockSpec(a.shape, lambda i: (0, 0))

    flops = 2 * B_pad * (D_in * H1 + H1 * H2 + H2 * H3 + H3 * H4)
    bytes_accessed = (int(x.size) * x.dtype.itemsize
                      + sum(int(v.size) * v.dtype.itemsize for v in prepared.values())
                      + B_pad * jnp.dtype(out_dtype).itemsize)

    out = pl.pallas_call(
        mlp_kernel,
        out_shape=jax.ShapeDtypeStruct((1, B_pad), out_dtype),
        grid_spec=pltpu.PrefetchScalarGridSpec(
            num_scalar_prefetch=0,
            grid=grid,
            in_specs=[
                pl.BlockSpec((tile_b, D_in), lambda i: (i, 0)),   # x tile over batch
                full(w1), full(b1),
                full(w2), full(b2),
                full(w3), full(b3),
                full(w4t), full(b4),
            ],
            # Lane-dense output row: block (1, tile_b) of the (1, B_pad) buffer;
            # every store is unmasked (padding columns are sliced off below).
            out_specs=pl.BlockSpec((1, tile_b), lambda i: (0, i)),
        ),
        compiler_params=pltpu.CompilerParams(
            # "parallel" batch axis lets v7x shard tiles across its 2 TensorCores.
            dimension_semantics=("parallel",)),
        cost_estimate=pl.CostEstimate(
            flops=flops, transcendentals=0, bytes_accessed=bytes_accessed),
    )(x, w1, b1, w2, b2, w3, b3, w4t, b4)

    return out.reshape(-1, 1)[:B]                      # (B, 1)


def init_params(key, input_size):
    """Deterministic init mirroring the PyTorch module's layer shapes."""
    ks = jax.random.split(key, 8)

    def linear(kw, kb, fan_in, fan_out):
        bound = 1.0 / jnp.sqrt(fan_in)
        w = jax.random.uniform(kw, (fan_in, fan_out), jnp.float32, -bound, bound)
        b = jax.random.uniform(kb, (1, fan_out), jnp.float32, -bound, bound)
        return w, b

    w1, b1 = linear(ks[0], ks[1], input_size, H1)
    w2, b2 = linear(ks[2], ks[3], H1, H2)
    w3, b3 = linear(ks[4], ks[5], H2, H3)
    w4, b4 = linear(ks[6], ks[7], H3, H4)
    return dict(w1=w1, b1=b1, w2=w2, b2=b2, w3=w3, b3=b3, w4=w4, b4=b4)


def reference_forward(x, p):
    h = jnp.maximum(x @ p["w1"] + p["b1"], 0.0)
    h = jnp.maximum(h @ p["w2"] + p["b2"], 0.0)
    h = jnp.maximum(h @ p["w3"] + p["b3"], 0.0)
    return h @ p["w4"] + p["b4"]


if __name__ == "__main__":
    key = jax.random.PRNGKey(0)
    k_x, k_p, k_x2, k_x3 = jax.random.split(key, 4)

    input_size = 32
    params = init_params(k_p, input_size)
    prepared_bf16 = prepare_params(params)                    # default bf16 MXU operands
    prepared_f32 = prepare_params(params, jnp.float32)        # tight-tolerance / v5e path

    # Small batch (matches module usage): pads 8 -> 128, grid = (1,).
    x_small = jax.random.normal(k_x, (8, input_size), jnp.float32)
    ref_small = reference_forward(x_small, params)
    out_small = jax.block_until_ready(optimized_nn_forward(x_small, prepared_bf16))
    assert out_small.shape == (8, 1)
    assert jnp.allclose(out_small, ref_small, atol=5e-2, rtol=5e-2), "bf16 small mismatch"
    out_small_f32 = jax.block_until_ready(optimized_nn_forward(x_small, prepared_f32))
    assert jnp.allclose(out_small_f32, ref_small, atol=1e-3, rtol=1e-3), "f32 small mismatch"

    # Mid batch, exact 128 multiple: forced 2-step grid (both v7x TCs), no padding.
    x_mid = jax.random.normal(k_x3, (512, input_size), jnp.float32)
    ref_mid = reference_forward(x_mid, params)
    out_mid = jax.block_until_ready(optimized_nn_forward(x_mid, prepared_bf16))
    assert out_mid.shape == (512, 1)
    assert jnp.allclose(out_mid, ref_mid, atol=5e-2, rtol=5e-2), "bf16 mid mismatch"

    # Larger ragged batch: balanced 2 x 2176 tiles, partial last input block, no jnp.pad.
    x_big = jax.random.normal(k_x2, (4100, input_size), jnp.float32)
    ref_big = reference_forward(x_big, params)
    out_big = jax.block_until_ready(optimized_nn_forward(x_big, prepared_bf16))
    assert out_big.shape == (4100, 1)
    assert jnp.allclose(out_big, ref_big, atol=5e-2, rtol=5e-2), "bf16 big mismatch"
    out_big_f32 = jax.block_until_ready(optimized_nn_forward(x_big, prepared_f32))
    assert jnp.allclose(out_big_f32, ref_big, atol=1e-3, rtol=1e-3), "f32 big mismatch"

    print("KERNEL_OK")
</pallas_src>

<mosaic_0001>
module attributes {stable_mosaic.version = 11 : i64} {
  func.func @mlp_kernel(%arg0: i32, %arg1: memref<128x32xf32, #tpu.memory_space<vmem>>, %arg2: memref<32x256xbf16, #tpu.memory_space<vmem>>, %arg3: memref<1x256xbf16, #tpu.memory_space<vmem>>, %arg4: memref<256x128xbf16, #tpu.memory_space<vmem>>, %arg5: memref<1x128xbf16, #tpu.memory_space<vmem>>, %arg6: memref<128x64xbf16, #tpu.memory_space<vmem>>, %arg7: memref<1x64xbf16, #tpu.memory_space<vmem>>, %arg8: memref<8x64xbf16, #tpu.memory_space<vmem>>, %arg9: memref<1x1xf32, #tpu.memory_space<vmem>>, %arg10: memref<1x128xf32, #tpu.memory_space<vmem>>) attributes {dimension_semantics = [#tpu.dimension_semantics<parallel>], iteration_bounds = array<i64: 1>, scalar_prefetch = 0 : i64, scratch_operands = 0 : i64, tpu.core_type = #tpu.core_type<tc>, window_params = [{transform_indices = @transform_0, window_bounds = array<i64: 128, 32>}, {pipeline_mode = #tpu.pipeline_mode<synchronous>, transform_indices = @transform_1, window_bounds = array<i64: 32, 256>}, {pipeline_mode = #tpu.pipeline_mode<synchronous>, transform_indices = @transform_2, window_bounds = array<i64: 1, 256>}, {pipeline_mode = #tpu.pipeline_mode<synchronous>, transform_indices = @transform_3, window_bounds = array<i64: 256, 128>}, {pipeline_mode = #tpu.pipeline_mode<synchronous>, transform_indices = @transform_4, window_bounds = array<i64: 1, 128>}, {pipeline_mode = #tpu.pipeline_mode<synchronous>, transform_indices = @transform_5, window_bounds = array<i64: 128, 64>}, {pipeline_mode = #tpu.pipeline_mode<synchronous>, transform_indices = @transform_6, window_bounds = array<i64: 1, 64>}, {pipeline_mode = #tpu.pipeline_mode<synchronous>, transform_indices = @transform_7, window_bounds = array<i64: 8, 64>}, {pipeline_mode = #tpu.pipeline_mode<synchronous>, transform_indices = @transform_8, window_bounds = array<i64: 1, 1>}, {transform_indices = @transform_9, window_bounds = array<i64: 1, 128>}]} {
    %c0 = arith.constant 0 : index
    %c0_0 = arith.constant 0 : index
    %0 = vector.load %arg1[%c0, %c0_0] : memref<128x32xf32, #tpu.memory_space<vmem>>, vector<128x32xf32>
    %1 = arith.truncf %0 : vector<128x32xf32> to vector<128x32xbf16>
    %c0_1 = arith.constant 0 : index
    %c0_2 = arith.constant 0 : index
    %2 = vector.load %arg2[%c0_1, %c0_2] : memref<32x256xbf16, #tpu.memory_space<vmem>>, vector<32x256xbf16>
    %cst = arith.constant dense<0.000000e+00> : vector<128x256xf32>
    %3 = tpu.matmul %1, %2, %cst {dimension_numbers = #tpu.dot_dimension_numbers<[1], [0], [0], [1], [0, 0, 1, 1], [], []>} : vector<128x32xbf16>, vector<32x256xbf16>, vector<128x256xf32> -> vector<128x256xf32>
    %4 = arith.truncf %3 : vector<128x256xf32> to vector<128x256xbf16>
    %c0_3 = arith.constant 0 : index
    %c0_4 = arith.constant 0 : index
    %5 = vector.load %arg3[%c0_3, %c0_4] : memref<1x256xbf16, #tpu.memory_space<vmem>>, vector<1x256xbf16>
    %6 = vector.broadcast %5 : vector<1x256xbf16> to vector<128x256xbf16>
    %7 = arith.addf %4, %6 : vector<128x256xbf16>
    %cst_5 = arith.constant 0.000000e+00 : bf16
    %8 = vector.broadcast %cst_5 : bf16 to vector<128x256xbf16>
    %9 = arith.maximumf %7, %8 : vector<128x256xbf16>
    %c0_6 = arith.constant 0 : index
    %c0_7 = arith.constant 0 : index
    %10 = vector.load %arg4[%c0_6, %c0_7] : memref<256x128xbf16, #tpu.memory_space<vmem>>, vector<256x128xbf16>
    %cst_8 = arith.constant dense<0.000000e+00> : vector<128x128xf32>
    %11 = tpu.matmul %9, %10, %cst_8 {dimension_numbers = #tpu.dot_dimension_numbers<[1], [0], [0], [1], [0, 0, 1, 1], [], []>} : vector<128x256xbf16>, vector<256x128xbf16>, vector<128x128xf32> -> vector<128x128xf32>
    %12 = arith.truncf %11 : vector<128x128xf32> to vector<128x128xbf16>
    %c0_9 = arith.constant 0 : index
    %c0_10 = arith.constant 0 : index
    %13 = vector.load %arg5[%c0_9, %c0_10] : memref<1x128xbf16, #tpu.memory_space<vmem>>, vector<1x128xbf16>
    %14 = vector.broadcast %13 : vector<1x128xbf16> to vector<128x128xbf16>
    %15 = arith.addf %12, %14 : vector<128x128xbf16>
    %cst_11 = arith.constant 0.000000e+00 : bf16
    %16 = vector.broadcast %cst_11 : bf16 to vector<128x128xbf16>
    %17 = arith.maximumf %15, %16 : vector<128x128xbf16>
    %c0_12 = arith.constant 0 : index
    %c0_13 = arith.constant 0 : index
    %18 = vector.load %arg6[%c0_12, %c0_13] : memref<128x64xbf16, #tpu.memory_space<vmem>>, vector<128x64xbf16>
    %cst_14 = arith.constant dense<0.000000e+00> : vector<128x64xf32>
    %19 = tpu.matmul %17, %18, %cst_14 {dimension_numbers = #tpu.dot_dimension_numbers<[1], [0], [0], [1], [0, 0, 1, 1], [], []>} : vector<128x128xbf16>, vector<128x64xbf16>, vector<128x64xf32> -> vector<128x64xf32>
    %20 = arith.truncf %19 : vector<128x64xf32> to vector<128x64xbf16>
    %c0_15 = arith.constant 0 : index
    %c0_16 = arith.constant 0 : index
    %21 = vector.load %arg7[%c0_15, %c0_16] : memref<1x64xbf16, #tpu.memory_space<vmem>>, vector<1x64xbf16>
    %22 = vector.broadcast %21 : vector<1x64xbf16> to vector<128x64xbf16>
    %23 = arith.addf %20, %22 : vector<128x64xbf16>
    %cst_17 = arith.constant 0.000000e+00 : bf16
    %24 = vector.broadcast %cst_17 : bf16 to vector<128x64xbf16>
    %25 = arith.maximumf %23, %24 : vector<128x64xbf16>
    %c0_18 = arith.constant 0 : index
    %c0_19 = arith.constant 0 : index
    %26 = vector.load %arg8[%c0_18, %c0_19] : memref<8x64xbf16, #tpu.memory_space<vmem>>, vector<8x64xbf16>
    %cst_20 = arith.constant dense<0.000000e+00> : vector<8x128xf32>
    %27 = tpu.matmul %26, %25, %cst_20 {dimension_numbers = #tpu.dot_dimension_numbers<[1], [1], [0], [0], [0, 0, 1, 0], [], []>} : vector<8x64xbf16>, vector<128x64xbf16>, vector<8x128xf32> -> vector<8x128xf32>
    %28 = vector.extract_strided_slice %27 {offsets = [0, 0], sizes = [1, 128], strides = [1, 1]} : vector<8x128xf32> to vector<1x128xf32>
    %c0_21 = arith.constant 0 : index
    %c0_22 = arith.constant 0 : index
    %29 = vector.load %arg9[%c0_21, %c0_22] : memref<1x1xf32, #tpu.memory_space<vmem>>, vector<1x1xf32>
    %30 = vector.broadcast %29 : vector<1x1xf32> to vector<1x128xf32>
    %31 = arith.addf %28, %30 : vector<1x128xf32>
    %c0_23 = arith.constant 0 : index
    %c0_24 = arith.constant 0 : index
    %32 = vector.load %arg10[%c0_23, %c0_24] : memref<1x128xf32, #tpu.memory_space<vmem>>, vector<1x128xf32>
    tpu.vector_store %arg10[%c0_23, %c0_24], %31 {strides = array<i32>} : memref<1x128xf32, #tpu.memory_space<vmem>>, vector<1x128xf32>,
    return
  }
  func.func @transform_0(%arg0: i32) -> (i32, i32) {
    %c0_i32 = arith.constant 0 : i32
    %c0_i32_0 = arith.constant 0 : i32
    return %arg0, %c0_i32 : i32, i32
  }
  func.func @transform_1(%arg0: i32) -> (i32, i32) {
    %c0_i32 = arith.constant 0 : i32
    %c0_i32_0 = arith.constant 0 : i32
    %c0_i32_1 = arith.constant 0 : i32
    return %c0_i32, %c0_i32_0 : i32, i32
  }
  func.func @transform_2(%arg0: i32) -> (i32, i32) {
    %c0_i32 = arith.constant 0 : i32
    %c0_i32_0 = arith.constant 0 : i32
    %c0_i32_1 = arith.constant 0 : i32
    return %c0_i32, %c0_i32_0 : i32, i32
  }
  func.func @transform_3(%arg0: i32) -> (i32, i32) {
    %c0_i32 = arith.constant 0 : i32
    %c0_i32_0 = arith.constant 0 : i32
    %c0_i32_1 = arith.constant 0 : i32
    return %c0_i32, %c0_i32_0 : i32, i32
  }
  func.func @transform_4(%arg0: i32) -> (i32, i32) {
    %c0_i32 = arith.constant 0 : i32
    %c0_i32_0 = arith.constant 0 : i32
    %c0_i32_1 = arith.constant 0 : i32
    return %c0_i32, %c0_i32_0 : i32, i32
  }
  func.func @transform_5(%arg0: i32) -> (i32, i32) {
    %c0_i32 = arith.constant 0 : i32
    %c0_i32_0 = arith.constant 0 : i32
    %c0_i32_1 = arith.constant 0 : i32
    return %c0_i32, %c0_i32_0 : i32, i32
  }
  func.func @transform_6(%arg0: i32) -> (i32, i32) {
    %c0_i32 = arith.constant 0 : i32
    %c0_i32_0 = arith.constant 0 : i32
    %c0_i32_1 = arith.constant 0 : i32
    return %c0_i32, %c0_i32_0 : i32, i32
  }
  func.func @transform_7(%arg0: i32) -> (i32, i32) {
    %c0_i32 = arith.constant 0 : i32
    %c0_i32_0 = arith.constant 0 : i32
    %c0_i32_1 = arith.constant 0 : i32
    return %c0_i32, %c0_i32_0 : i32, i32
  }
  func.func @transform_8(%arg0: i32) -> (i32, i32) {
    %c0_i32 = arith.constant 0 : i32
    %c0_i32_0 = arith.constant 0 : i32
    %c0_i32_1 = arith.constant 0 : i32
    return %c0_i32, %c0_i32_0 : i32, i32
  }
  func.func @transform_9(%arg0: i32) -> (i32, i32) {
    %c0_i32 = arith.constant 0 : i32
    %c0_i32_0 = arith.constant 0 : i32
    return %c0_i32, %arg0 : i32, i32
  }
}

</mosaic_0001>

<bundles_post_ra>
// kernel: optimized_nn_forward.1
= control target key start
LH: loop header
LB: loop body
LE: loop exit
PB: predicated region body
PF: predicated region fallthrough
CT: control target
= control target key end

     0   :  { %vm83_vm0 = vcmask 261120   ;;  %vm955_vm1 = vcmask 523264   ;;  %s1505_s1 = inlined_call_operand.vmem [shape: bf16[32,256], index: 1, kind: input, shape index: {}]   ;;  %s1506_s0 = inlined_call_operand.vmem [shape: f32[128,32], index: 0, kind: input, shape index: {}]   ;;  %s1507_s3 = inlined_call_operand.vmem [shape: bf16[256,128], index: 3, kind: input, shape index: {}]   ;;  %s1508_s2 = inlined_call_operand.vmem [shape: bf16[1,256], index: 2, kind: input, shape index: {}]   ;;  %s1509_s5 = inlined_call_operand.vmem [shape: bf16[128,64], index: 5, kind: input, shape index: {}]   ;;  %s1510_s4 = inlined_call_operand.vmem [shape: bf16[1,128], index: 4, kind: input, shape index: {}]   ;;  %s1511_s6 = inlined_call_operand.vmem [shape: bf16[1,64], index: 6, kind: input, shape index: {}]   ;;  %s1512_s8 = inlined_call_operand.<no memory space> [shape: f32[1,1], index: 8, kind: input, shape index: {}]   ;;  %s1513_s7 = inlined_call_operand.vmem [shape: bf16[8,64], index: 7, kind: input, shape index: {}]   ;;  %s1514_s9 = inlined_call_operand.vmem [shape: f32[1,128], index: 9, kind: output, shape index: {}]  }
   0x1   :  { %v1019_v0 = vld [vmem:[%s1505_s1 + $0x10] sm:$0xf]  ;;  %v1141_v1 = vld [vmem:[%s1505_s1 + $0x14] sm:$0xf0]  ;;  %v1011_v2 = vld [vmem:[%s1505_s1] sm:$0xf] }
   0x2   :  { %v1020_v3 = vor.u32 %v1141_v1, %v1019_v0  ;;  %v1139_v4 = vld [vmem:[%s1505_s1 + $0x4] sm:$0xf0]  ;;  %v39_v5 = vld [vmem:[%s1506_s0 + $0x20] sm:$0xff]  ;;  %v1140_v10 = vld [vmem:[%s1505_s1 + $0x14] sm:$0xf] }
   0x3   :  { %v40_v6 = vld [vmem:[%s1506_s0 + $0x28] sm:$0xff]  ;;  %v35_v7 = vld [vmem:[%s1506_s0] sm:$0xff]  ;;  %v1012_v8 = vor.u32 %v1139_v4, %v1011_v2  ;;  %v1021_v11 = vld [vmem:[%s1505_s1 + $0x18] sm:$0xf0] }
   0x4   :  { %1166 = vmatpush.bf16.msra.mxu1 %v1020_v3  ;;  %114 = vmatpush.bf16.msra.mxu0 %v1020_v3  ;;  %v36_v9 = vld [vmem:[%s1506_s0 + $0x8] sm:$0xff]  ;;  %v1024_v12 = vor.u32 %v1140_v10, %v1021_v11  ;;  %v1138_v13 = vld [vmem:[%s1505_s1 + $0x4] sm:$0xf]  ;;  %v53_v15 = vpack.c.bf16 %v40_v6, %v39_v5  ;;  %v41_v18 = vld [vmem:[%s1506_s0 + $0x30] sm:$0xff] }
   0x5   :  { %1167 = vmatpush.bf16.msra.mxu2 %v1020_v3  ;;  %1168 = vmatpush.bf16.msra.mxu3 %v1020_v3  ;;  %v1013_v14 = vld [vmem:[%s1505_s1 + $0x8] sm:$0xf0]  ;;  %v51_v16 = vpack.c.bf16 %v36_v9, %v35_v7  ;;  %v42_v19 = vld [vmem:[%s1506_s0 + $0x38] sm:$0xff]  ;;  %v37_v20 = vld [vmem:[%s1506_s0 + $0x10] sm:$0xff] }
   0x6   :  { %v1016_v17 = vor.u32 %v1138_v13, %v1013_v14  ;;  %v38_v21 = vld [vmem:[%s1506_s0 + $0x18] sm:$0xff]  ;;  %v54_v22 = vpack.c.bf16 %v42_v19, %v41_v18  ;;  %v43_v24 = vld [vmem:[%s1506_s0 + $0x40] sm:$0xff]  ;;  %v44_v25 = vld [vmem:[%s1506_s0 + $0x48] sm:$0xff] }
   0x7   :  { %v52_v23 = vpack.c.bf16 %v38_v21, %v37_v20  ;;  %v55_v26 = vpack.c.bf16 %v44_v25, %v43_v24  ;;  %v45_v27 = vld [vmem:[%s1506_s0 + $0x50] sm:$0xff]  ;;  %v46_v28 = vld [vmem:[%s1506_s0 + $0x58] sm:$0xff]  ;;  %v47_v30 = vld [vmem:[%s1506_s0 + $0x60] sm:$0xff] }
   0x8   :  { %1169 = vmatpush.bf16.msra.mxu1 %v1012_v8  ;;  %115 = vmatpush.bf16.msra.mxu0 %v1012_v8  ;;  %v56_v29 = vpack.c.bf16 %v46_v28, %v45_v27  ;;  %v48_v31 = vld [vmem:[%s1506_s0 + $0x68] sm:$0xff]  ;;  %v49_v33 = vld [vmem:[%s1506_s0 + $0x70] sm:$0xff]  ;;  %v50_v34 = vld [vmem:[%s1506_s0 + $0x78] sm:$0xff] }
   0x9   :  { %1170 = vmatpush.bf16.msra.mxu2 %v1012_v8  ;;  %1171 = vmatpush.bf16.msra.mxu3 %v1012_v8  ;;  %v57_v32 = vpack.c.bf16 %v48_v31, %v47_v30  ;;  %v58_v35 = vpack.c.bf16 %v50_v34, %v49_v33  ;;  %v1149_v36 = vld [vmem:[%s1507_s3 + $0x38] sm:$0xff]  ;;  %v1148_v38 = vld [vmem:[%s1507_s3 + $0x30] sm:$0xff]  ;;  %v222_v40 = vld [vmem:[%s1508_s2] sm:$0x3] }
   0xa   :  { %v1157_v37 = vld [vmem:[%s1507_s3 + $0x78] sm:$0xff]  ;;  %v1156_v39 = vld [vmem:[%s1507_s3 + $0x70] sm:$0xff]  ;;  %224 = vst [vmem:[#allocation1] ss:$9 sm:$0xff] %v222_v40  ;;  %v1147_v41 = vld [vmem:[%s1507_s3 + $0x28] sm:$0xff] }
   0xb   :  { %1027 = vmatmul.msk.bf16.vlgmr.msra.gmra.mxu1 %vm83_vm0, %v53_v15  ;;  %1025 = vmatmul.msk.bf16.vlgmr.msra.gmra.mxu0 %vm83_vm0, %v51_v16  ;;  %v1155_v42 = vld [vmem:[%s1507_s3 + $0x68] sm:$0xff]  ;;  %v1146_v43 = vld [vmem:[%s1507_s3 + $0x20] sm:$0xff]  ;;  %v1145_v46 = vld [vmem:[%s1507_s3 + $0x18] sm:$0xff] }
   0xc   :  { %163 = vmatpush.bf16.msrb.mxu1 %v1024_v12  ;;  %1029 = vmatmul.msk.bf16.vlgmr.msra.gmra.mxu2 %vm83_vm0, %v55_v26  ;;  %v1154_v44 = vld [vmem:[%s1507_s3 + $0x60] sm:$0xff]  ;;  %v1153_v47 = vld [vmem:[%s1507_s3 + $0x58] sm:$0xff]  ;;  %v1144_v48 = vld [vmem:[%s1507_s3 + $0x10] sm:$0xff] }
   0xd   :  { %1032 = vmatmul.msk.bf16.vlgmr.msra.gmra.mxu3 %vm83_vm0, %v58_v35  ;;  %523 = vmatpush.bf16.msrb.mxu2 %v1149_v36  ;;  %v1152_v49 = vld [vmem:[%s1507_s3 + $0x50] sm:$0xff]  ;;  %v1143_v51 = vld [vmem:[%s1507_s3 + $0x8] sm:$0xff]  ;;  %v1142_v53 = vld [vmem:[%s1507_s3] sm:$0xff] }
   0xe   :  { %572 = vmatpush.bf16.msrb.mxu3 %v1157_v37  ;;  %v1151_v52 = vld [vmem:[%s1507_s3 + $0x48] sm:$0xff]  ;;  %v1150_v54 = vld [vmem:[%s1507_s3 + $0x40] sm:$0xff] }
  0x10   :  { %164 = vmatpush.bf16.msrb.mxu1 %v1016_v17 }
  0x11   :  { %524 = vmatpush.bf16.msrb.mxu2 %v1148_v38  ;;  %v225_v58 = vld [vmem:[#allocation1] sm:$0xff]  ;;  %v226_v59 = vld [vmem:[#allocation1 + $0x9] sm:$0xff] }
  0x12   :  { %573 = vmatpush.bf16.msrb.mxu3 %v1156_v39  ;;  %v227_v60 = vpack.i.b16 %v225_v58, %v225_v58  ;;  %v230_v61 = vpack.i.b16 %v226_v59, %v226_v59 }
  0x14   :  { %v229_v0 = vperm.slane %v227_v60, 0  ;;  %v232_v1 = vperm.slane %v230_v61, 0 }
  0x15   :  { %525 = vmatpush.bf16.msrb.mxu2 %v1147_v41 }
  0x16   :  { %574 = vmatpush.bf16.msrb.mxu3 %v1155_v42  ;;  %v1372_v5 = vunpack.c.l.bf16 %v229_v0  ;;  %v1374_v6 = vunpack.c.l.bf16 %v232_v1 }
  0x19   :  { %526 = vmatpush.bf16.msrb.mxu2 %v1146_v43 }
  0x1a   :  { %575 = vmatpush.bf16.msrb.mxu3 %v1154_v44 }
  0x1b   :  { %1028 = vmatmul.msk.bf16.gmra.mxu1 %vm83_vm0, %v54_v22  ;;  %1026 = vmatmul.msk.bf16.gmra.mxu0 %vm83_vm0, %v52_v23 }
  0x1c   :  { %1030 = vmatmul.msk.bf16.gmra.mxu2 %vm83_vm0, %v56_v29 }
  0x1d   :  { %527 = vmatpush.bf16.msrb.mxu2 %v1145_v46 }
  0x1e   :  { %576 = vmatpush.bf16.msrb.mxu3 %v1153_v47 }
  0x21   :  { %528 = vmatpush.bf16.msrb.mxu2 %v1144_v48 }
  0x22   :  { %577 = vmatpush.bf16.msrb.mxu3 %v1152_v49 }
  0x25   :  { %529 = vmatpush.bf16.msrb.mxu2 %v1143_v51 }
  0x26   :  { %578 = vmatpush.bf16.msrb.mxu3 %v1151_v52 }
  0x29   :  { %530 = vmatpush.bf16.msrb.mxu2 %v1142_v53 }
  0x2a   :  { %579 = vmatpush.bf16.msrb.mxu3 %v1150_v54 }
  0x2b   :  { %1033 = vmatmul.msk.bf16.vlgmr.msrb.gmra.mxu1 %vm83_vm0, %v51_v16 }
  0x2c   :  { %1031 = vmatmul.msk.bf16.gmra.mxu2 %vm83_vm0, %v57_v32 }
  0x3b   :  { %1034 = vmatmul.msk.bf16.gmra.mxu1 %vm83_vm0, %v52_v23 }
  0x4b   :  { %1035 = vmatmul.msk.bf16.gmra.mxu1 %vm83_vm0, %v53_v15 }
  0x5b   :  { %1036 = vmatmul.msk.bf16.gmra.mxu1 %vm83_vm0, %v54_v22 }
  0x6b   :  { %1037 = vmatmul.msk.bf16.gmra.mxu1 %vm83_vm0, %v55_v26 }
  0x7b   :  { %1038 = vmatmul.msk.bf16.gmra.mxu1 %vm83_vm0, %v56_v29 }
  0x88   :  { %v1338_v45 = vpop.f32.mrf.mxu1  ;;  %v117_v57 = vpop.f32.mrf.mxu0 }
  0x8b   :  { %1039 = vmatmul.msk.bf16.gmra.mxu1 %vm83_vm0, %v57_v32 }
  0x90   :  { %v1353_v50 = vpop.f32.mrf.mxu1  ;;  %v119_v2 = vpop.f32.mrf.mxu0 }
  0x98   :  { %v1367_v55 = vpop.f32.mrf.mxu1  ;;  %v122_v15 = vpop.f32.mrf.mxu0 }
  0x9b   :  { %1040 = vmatmul.msk.bf16.gmra.mxu1 %vm83_vm0, %v58_v35 }
  0xa0   :  { %v1370_v56 = vpop.f32.mrf.mxu1  ;;  %v124_v26 = vpop.f32.mrf.mxu0 }
  0xa8   :  { %v166_v62 = vpop.f32.mrf.mxu1 }
  0xa9   :  { %v206_v63 = vpack.c.bf16 %v166_v62, %v117_v57 }
  0xab   :  { %v233_v3 = vunpack.c.l.bf16 %v206_v63  ;;  %v234_v4 = vunpack.c.h.bf16 %v206_v63 }
  0xad   :  { %v267_v9 = vadd.f32 %v1372_v5, %v233_v3  ;;  %v268_v10 = vadd.f32 %v1374_v6, %v234_v4 }
  0xaf   :  { %v347_v16 = vmax.f32 %v267_v9, 0.0  ;;  %v348_v17 = vmax.f32 %v268_v10, 0.0 }
  0xb0   :  { %v168_v7 = vpop.f32.mrf.mxu1 }
  0xb1   :  { %v207_v8 = vpack.c.bf16 %v168_v7, %v119_v2 }
  0xb3   :  { %v235_v11 = vunpack.c.l.bf16 %v207_v8  ;;  %v236_v12 = vunpack.c.h.bf16 %v207_v8 }
  0xb5   :  { %v269_v13 = vadd.f32 %v1372_v5, %v235_v11  ;;  %v270_v14 = vadd.f32 %v1374_v6, %v236_v12 }
  0xb7   :  { %v349_v18 = vmax.f32 %v269_v13, 0.0  ;;  %v350_v19 = vmax.f32 %v270_v14, 0.0 }
  0xb8   :  { %v171_v20 = vpop.f32.mrf.mxu1 }
  0xb9   :  { %v379_v21 = vpack.c.bf16 %v349_v18, %v347_v16  ;;  %v380_v22 = vpack.c.bf16 %v350_v19, %v348_v17  ;;  %v208_v23 = vpack.c.bf16 %v171_v20, %v122_v15 }
  0xbb   :  { %531 = vmatmul.bf16.vlgmr.msrb.gmra.mxu2 %v379_v21  ;;  %580 = vmatmul.bf16.vlgmr.msrb.gmra.mxu3 %v380_v22  ;;  %v237_v24 = vunpack.c.l.bf16 %v208_v23  ;;  %v238_v25 = vunpack.c.h.bf16 %v208_v23 }
  0xbd   :  { %v271_v31 = vadd.f32 %v1372_v5, %v237_v24  ;;  %v272_v32 = vadd.f32 %v1374_v6, %v238_v25 }
  0xbf   :  { %v351_v35 = vmax.f32 %v271_v31, 0.0  ;;  %v352_v37 = vmax.f32 %v272_v32, 0.0 }
  0xc0   :  { %v173_v27 = vpop.f32.mrf.mxu1 }
  0xc1   :  { %v209_v28 = vpack.c.bf16 %v173_v27, %v124_v26 }
  0xc3   :  { %v239_v29 = vunpack.c.l.bf16 %v209_v28  ;;  %v240_v30 = vunpack.c.h.bf16 %v209_v28 }
  0xc5   :  { %v273_v33 = vadd.f32 %v1372_v5, %v239_v29  ;;  %v274_v34 = vadd.f32 %v1374_v6, %v240_v30 }
  0xc7   :  { %v353_v36 = vmax.f32 %v273_v33, 0.0  ;;  %v354_v38 = vmax.f32 %v274_v34, 0.0 }
  0xc8   :  { %v176_v39 = vpop.f32.mrf.mxu1 }
  0xc9   :  { %v381_v40 = vpack.c.bf16 %v353_v36, %v351_v35  ;;  %v382_v41 = vpack.c.bf16 %v354_v38, %v352_v37  ;;  %v210_v42 = vpack.c.bf16 %v176_v39, %v1338_v45 }
  0xcb   :  { %536 = vmatmul.bf16.gmra.mxu2 %v381_v40  ;;  %585 = vmatmul.bf16.gmra.mxu3 %v382_v41  ;;  %v241_v43 = vunpack.c.l.bf16 %v210_v42  ;;  %v242_v44 = vunpack.c.h.bf16 %v210_v42 }
  0xcd   :  { %v275_v51 = vadd.f32 %v1372_v5, %v241_v43  ;;  %v276_v52 = vadd.f32 %v1374_v6, %v242_v44 }
  0xcf   :  { %v355_v57 = vmax.f32 %v275_v51, 0.0  ;;  %v356_v45 = vmax.f32 %v276_v52, 0.0 }
  0xd0   :  { %v178_v46 = vpop.f32.mrf.mxu1 }
  0xd1   :  { %v211_v47 = vpack.c.bf16 %v178_v46, %v1353_v50  ;;  %v137_v50 = vpop.f32.mrf.mxu2 }
  0xd3   :  { %v243_v48 = vunpack.c.l.bf16 %v211_v47  ;;  %v244_v49 = vunpack.c.h.bf16 %v211_v47 }
  0xd5   :  { %v277_v53 = vadd.f32 %v1372_v5, %v243_v48  ;;  %v278_v54 = vadd.f32 %v1374_v6, %v244_v49 }
  0xd7   :  { %v357_v58 = vmax.f32 %v277_v53, 0.0  ;;  %v358_v59 = vmax.f32 %v278_v54, 0.0 }
  0xd8   :  { %v181_v60 = vpop.f32.mrf.mxu1 }
  0xd9   :  { %v383_v61 = vpack.c.bf16 %v357_v58, %v355_v57  ;;  %v384_v62 = vpack.c.bf16 %v358_v59, %v356_v45  ;;  %v212_v63 = vpack.c.bf16 %v181_v60, %v1367_v55  ;;  %v139_v15 = vpop.f32.mrf.mxu2 }
  0xdb   :  { %541 = vmatmul.bf16.gmra.mxu2 %v383_v61  ;;  %590 = vmatmul.bf16.gmra.mxu3 %v384_v62  ;;  %v245_v0 = vunpack.c.l.bf16 %v212_v63  ;;  %v246_v1 = vunpack.c.h.bf16 %v212_v63  ;;  %v1165_v61 = vld [vmem:[%s1509_s5 + $0x38] sm:$0xff]  ;;  %v1164_v62 = vld [vmem:[%s1509_s5 + $0x30] sm:$0xff] }
  0xdc   :  { %795 = vmatpush.bf16.msrb.mxu0 %v1165_v61 }
  0xdd   :  { %v279_v8 = vadd.f32 %v1372_v5, %v245_v0  ;;  %v280_v9 = vadd.f32 %v1374_v6, %v246_v1 }
  0xdf   :  { %v359_v12 = vmax.f32 %v279_v8, 0.0  ;;  %v360_v13 = vmax.f32 %v280_v9, 0.0 }
  0xe0   :  { %v183_v2 = vpop.f32.mrf.mxu1  ;;  %796 = vmatpush.bf16.msrb.mxu0 %v1164_v62 }
  0xe1   :  { %v213_v3 = vpack.c.bf16 %v183_v2, %v1370_v56  ;;  %v142_v23 = vpop.f32.mrf.mxu2 }
  0xe3   :  { %v247_v4 = vunpack.c.l.bf16 %v213_v3  ;;  %v248_v7 = vunpack.c.h.bf16 %v213_v3  ;;  %v1163_v3 = vld [vmem:[%s1509_s5 + $0x28] sm:$0xff] }
  0xe4   :  { %797 = vmatpush.bf16.msrb.mxu0 %v1163_v3 }
  0xe5   :  { %v281_v10 = vadd.f32 %v1372_v5, %v247_v4  ;;  %v282_v11 = vadd.f32 %v1374_v6, %v248_v7 }
  0xe7   :  { %v361_v55 = vmax.f32 %v281_v10, 0.0  ;;  %v362_v14 = vmax.f32 %v282_v11, 0.0 }
  0xe8   :  { %v186_v16 = vpop.f32.mrf.mxu1 }
  0xe9   :  { %v385_v17 = vpack.c.bf16 %v361_v55, %v359_v12  ;;  %v386_v18 = vpack.c.bf16 %v362_v14, %v360_v13  ;;  %v214_v19 = vpack.c.bf16 %v186_v16, %v137_v50  ;;  %v144_v38 = vpop.f32.mrf.mxu2  ;;  %v152_v12 = vpop.f32.mrf.mxu3 }
  0xeb   :  { %546 = vmatmul.bf16.gmra.mxu2 %v385_v17  ;;  %595 = vmatmul.bf16.gmra.mxu3 %v386_v18  ;;  %v249_v56 = vunpack.c.l.bf16 %v214_v19  ;;  %v250_v20 = vunpack.c.h.bf16 %v214_v19 }
  0xed   :  { %v283_v26 = vadd.f32 %v1372_v5, %v249_v56  ;;  %v284_v27 = vadd.f32 %v1374_v6, %v250_v20  ;;  %v1162_v56 = vld [vmem:[%s1509_s5 + $0x20] sm:$0xff] }
  0xee   :  { %798 = vmatpush.bf16.msrb.mxu0 %v1162_v56 }
  0xef   :  { %v363_v30 = vmax.f32 %v283_v26, 0.0  ;;  %v364_v32 = vmax.f32 %v284_v27, 0.0 }
  0xf0   :  { %v188_v21 = vpop.f32.mrf.mxu1 }
  0xf1   :  { %v215_v22 = vpack.c.bf16 %v188_v21, %v139_v15  ;;  %v147_v51 = vpop.f32.mrf.mxu2 }
  0xf3   :  { %v251_v24 = vunpack.c.l.bf16 %v215_v22  ;;  %v252_v25 = vunpack.c.h.bf16 %v215_v22  ;;  %v154_v22 = vpop.f32.mrf.mxu3 }
  0xf5   :  { %v285_v28 = vadd.f32 %v1372_v5, %v251_v24  ;;  %v286_v29 = vadd.f32 %v1374_v6, %v252_v25  ;;  %v1161_v25 = vld [vmem:[%s1509_s5 + $0x18] sm:$0xff] }
  0xf6   :  { %799 = vmatpush.bf16.msrb.mxu0 %v1161_v25 }
  0xf7   :  { %v365_v31 = vmax.f32 %v285_v28, 0.0  ;;  %v366_v33 = vmax.f32 %v286_v29, 0.0 }
  0xf8   :  { %v191_v34 = vpop.f32.mrf.mxu1 }
  0xf9   :  { %v387_v35 = vpack.c.bf16 %v365_v31, %v363_v30  ;;  %v388_v36 = vpack.c.bf16 %v366_v33, %v364_v32  ;;  %v216_v37 = vpack.c.bf16 %v191_v34, %v142_v23  ;;  %v149_v0 = vpop.f32.mrf.mxu2  ;;  %v1160_v32 = vld [vmem:[%s1509_s5 + $0x10] sm:$0xff] }
  0xfa   :  { %800 = vmatpush.bf16.msrb.mxu0 %v1160_v32 }
  0xfb   :  { %551 = vmatmul.bf16.gmra.mxu2 %v387_v35  ;;  %600 = vmatmul.bf16.gmra.mxu3 %v388_v36  ;;  %v253_v39 = vunpack.c.l.bf16 %v216_v37  ;;  %v254_v40 = vunpack.c.h.bf16 %v216_v37 }
  0xfd   :  { %v287_v46 = vadd.f32 %v1372_v5, %v253_v39  ;;  %v288_v47 = vadd.f32 %v1374_v6, %v254_v40  ;;  %v1159_v39 = vld [vmem:[%s1509_s5 + $0x8] sm:$0xff] }
  0xfe   :  { %801 = vmatpush.bf16.msrb.mxu0 %v1159_v39 }
  0xff   :  { %v367_v52 = vmax.f32 %v287_v46, 0.0  ;;  %v368_v54 = vmax.f32 %v288_v47, 0.0 }
 0x100   :  { %v193_v41 = vpop.f32.mrf.mxu1 }
 0x101   :  { %v217_v42 = vpack.c.bf16 %v193_v41, %v144_v38 }
 0x103   :  { %v255_v43 = vunpack.c.l.bf16 %v217_v42  ;;  %v256_v44 = vunpack.c.h.bf16 %v217_v42 }
 0x105   :  { %v289_v48 = vadd.f32 %v1372_v5, %v255_v43  ;;  %v290_v49 = vadd.f32 %v1374_v6, %v256_v44 }
 0x107   :  { %v369_v53 = vmax.f32 %v289_v48, 0.0  ;;  %v370_v57 = vmax.f32 %v290_v49, 0.0 }
 0x108   :  { %v196_v58 = vpop.f32.mrf.mxu1 }
 0x109   :  { %v389_v45 = vpack.c.bf16 %v369_v53, %v367_v52  ;;  %v390_v59 = vpack.c.bf16 %v370_v57, %v368_v54  ;;  %v218_v60 = vpack.c.bf16 %v196_v58, %v147_v51 }
 0x10b   :  { %556 = vmatmul.bf16.gmra.mxu2 %v389_v45  ;;  %605 = vmatmul.bf16.gmra.mxu3 %v390_v59  ;;  %v257_v63 = vunpack.c.l.bf16 %v218_v60  ;;  %v258_v50 = vunpack.c.h.bf16 %v218_v60 }
 0x10d   :  { %v291_v8 = vadd.f32 %v1372_v5, %v257_v63  ;;  %v292_v9 = vadd.f32 %v1374_v6, %v258_v50 }
 0x10f   :  { %v371_v55 = vmax.f32 %v291_v8, 0.0  ;;  %v372_v14 = vmax.f32 %v292_v9, 0.0 }
 0x110   :  { %v198_v1 = vpop.f32.mrf.mxu1 }
 0x111   :  { %v219_v2 = vpack.c.bf16 %v198_v1, %v149_v0 }
 0x113   :  { %v259_v4 = vunpack.c.l.bf16 %v219_v2  ;;  %v260_v7 = vunpack.c.h.bf16 %v219_v2 }
 0x115   :  { %v293_v10 = vadd.f32 %v1372_v5, %v259_v4  ;;  %v294_v11 = vadd.f32 %v1374_v6, %v260_v7 }
 0x117   :  { %v373_v13 = vmax.f32 %v293_v10, 0.0  ;;  %v374_v15 = vmax.f32 %v294_v11, 0.0 }
 0x118   :  { %v201_v16 = vpop.f32.mrf.mxu1 }
 0x119   :  { %v391_v17 = vpack.c.bf16 %v373_v13, %v371_v55  ;;  %v392_v18 = vpack.c.bf16 %v374_v15, %v372_v14  ;;  %v220_v19 = vpack.c.bf16 %v201_v16, %v152_v12 }
 0x11b   :  { %561 = vmatmul.bf16.gmra.mxu2 %v391_v17  ;;  %610 = vmatmul.bf16.gmra.mxu3 %v392_v18  ;;  %v261_v20 = vunpack.c.l.bf16 %v220_v19  ;;  %v262_v21 = vunpack.c.h.bf16 %v220_v19 }
 0x11d   :  { %v295_v28 = vadd.f32 %v1372_v5, %v261_v20  ;;  %v296_v29 = vadd.f32 %v1374_v6, %v262_v21 }
 0x11f   :  { %v375_v33 = vmax.f32 %v295_v28, 0.0  ;;  %v376_v35 = vmax.f32 %v296_v29, 0.0 }
 0x120   :  { %v203_v23 = vpop.f32.mrf.mxu1 }
 0x121   :  { %v221_v24 = vpack.c.bf16 %v203_v23, %v154_v22 }
 0x123   :  { %v263_v26 = vunpack.c.l.bf16 %v221_v24  ;;  %v264_v27 = vunpack.c.h.bf16 %v221_v24 }
 0x125   :  { %v297_v30 = vadd.f32 %v1372_v5, %v263_v26  ;;  %v298_v31 = vadd.f32 %v1374_v6, %v264_v27  ;;  %v1158_v5 = vld [vmem:[%s1509_s5] sm:$0xff] }
 0x126   :  { %802 = vmatpush.bf16.msrb.mxu0 %v1158_v5  ;;  %v637_v6 = vld [vmem:[%s1510_s4] sm:$0x1] }
 0x127   :  { %v377_v34 = vmax.f32 %v297_v30, 0.0  ;;  %v378_v36 = vmax.f32 %v298_v31, 0.0  ;;  %v639_v43 = vpack.i.b16 %v637_v6, %v637_v6 }
 0x129   :  { %v393_v37 = vpack.c.bf16 %v377_v34, %v375_v33  ;;  %v394_v38 = vpack.c.bf16 %v378_v36, %v376_v35  ;;  %v641_v46 = vperm.slane %v639_v43, 0 }
 0x12b   :  { %566 = vmatmul.bf16.gmra.mxu2 %v393_v37  ;;  %615 = vmatmul.bf16.gmra.mxu3 %v394_v38  ;;  %v1439_v51 = vunpack.c.l.bf16 %v641_v46 }
 0x13e   :  { %v532_v40 = vpop.f32.mrf.mxu2  ;;  %v581_v41 = vpop.f32.mrf.mxu3 }
 0x13f   :  { %v582_v42 = vadd.f32 %v581_v41, %v532_v40 }
 0x141   :  { %v621_v44 = vpack.c.bf16 %v582_v42, %v582_v42 }
 0x143   :  { %v642_v49 = vunpack.c.l.bf16 %v621_v44 }
 0x145   :  { %v659_v54 = vadd.f32 %v1439_v51, %v642_v49 }
 0x146   :  { %v534_v47 = vpop.f32.mrf.mxu2  ;;  %v583_v48 = vpop.f32.mrf.mxu3 }
 0x147   :  { %v584_v52 = vadd.f32 %v583_v48, %v534_v47  ;;  %v707_v60 = vmax.f32 %v659_v54, 0.0 }
 0x149   :  { %v622_v53 = vpack.c.bf16 %v584_v52, %v584_v52 }
 0x14b   :  { %v643_v57 = vunpack.c.l.bf16 %v622_v53 }
 0x14d   :  { %v660_v58 = vadd.f32 %v1439_v51, %v643_v57 }
 0x14e   :  { %v537_v45 = vpop.f32.mrf.mxu2  ;;  %v586_v59 = vpop.f32.mrf.mxu3 }
 0x14f   :  { %v708_v61 = vmax.f32 %v660_v58, 0.0  ;;  %v587_v62 = vadd.f32 %v586_v59, %v537_v45 }
 0x151   :  { %v723_v63 = vpack.c.bf16 %v708_v61, %v707_v60  ;;  %v623_v50 = vpack.c.bf16 %v587_v62, %v587_v62 }
 0x153   :  { %803 = vmatmul.bf16.vlgmr.msrb.gmra.mxu0 %v723_v63  ;;  %v644_v2 = vunpack.c.l.bf16 %v623_v50 }
 0x155   :  { %v661_v7 = vadd.f32 %v1439_v51, %v644_v2 }
 0x156   :  { %v539_v0 = vpop.f32.mrf.mxu2  ;;  %v588_v1 = vpop.f32.mrf.mxu3 }
 0x157   :  { %v589_v3 = vadd.f32 %v588_v1, %v539_v0  ;;  %v709_v55 = vmax.f32 %v661_v7, 0.0 }
 0x159   :  { %v624_v4 = vpack.c.bf16 %v589_v3, %v589_v3 }
 0x15b   :  { %v645_v8 = vunpack.c.l.bf16 %v624_v4 }
 0x15d   :  { %v662_v9 = vadd.f32 %v1439_v51, %v645_v8 }
 0x15e   :  { %v542_v10 = vpop.f32.mrf.mxu2  ;;  %v591_v11 = vpop.f32.mrf.mxu3 }
 0x15f   :  { %v592_v12 = vadd.f32 %v591_v11, %v542_v10  ;;  %v710_v13 = vmax.f32 %v662_v9, 0.0 }
 0x161   :  { %v724_v14 = vpack.c.bf16 %v710_v13, %v709_v55  ;;  %v625_v15 = vpack.c.bf16 %v592_v12, %v592_v12 }
 0x163   :  { %808 = vmatmul.bf16.gmra.mxu0 %v724_v14  ;;  %v646_v18 = vunpack.c.l.bf16 %v625_v15 }
 0x165   :  { %v663_v20 = vadd.f32 %v1439_v51, %v646_v18 }
 0x166   :  { %v544_v16 = vpop.f32.mrf.mxu2  ;;  %v593_v17 = vpop.f32.mrf.mxu3 }
 0x167   :  { %v594_v19 = vadd.f32 %v593_v17, %v544_v16  ;;  %v711_v26 = vmax.f32 %v663_v20, 0.0 }
 0x169   :  { %v626_v56 = vpack.c.bf16 %v594_v19, %v594_v19 }
 0x16b   :  { %v647_v21 = vunpack.c.l.bf16 %v626_v56 }
 0x16d   :  { %v664_v22 = vadd.f32 %v1439_v51, %v647_v21 }
 0x16e   :  { %v547_v23 = vpop.f32.mrf.mxu2  ;;  %v596_v24 = vpop.f32.mrf.mxu3 }
 0x16f   :  { %v597_v25 = vadd.f32 %v596_v24, %v547_v23  ;;  %v712_v27 = vmax.f32 %v664_v22, 0.0 }
 0x171   :  { %v725_v28 = vpack.c.bf16 %v712_v27, %v711_v26  ;;  %v627_v29 = vpack.c.bf16 %v597_v25, %v597_v25 }
 0x173   :  { %813 = vmatmul.bf16.gmra.mxu0 %v725_v28  ;;  %v648_v32 = vunpack.c.l.bf16 %v627_v29 }
 0x175   :  { %v665_v35 = vadd.f32 %v1439_v51, %v648_v32 }
 0x176   :  { %v549_v30 = vpop.f32.mrf.mxu2  ;;  %v598_v31 = vpop.f32.mrf.mxu3 }
 0x177   :  { %v599_v33 = vadd.f32 %v598_v31, %v549_v30  ;;  %v713_v6 = vmax.f32 %v665_v35, 0.0 }
 0x179   :  { %v628_v34 = vpack.c.bf16 %v599_v33, %v599_v33 }
 0x17b   :  { %v649_v36 = vunpack.c.l.bf16 %v628_v34 }
 0x17d   :  { %v666_v37 = vadd.f32 %v1439_v51, %v649_v36 }
 0x17e   :  { %v552_v38 = vpop.f32.mrf.mxu2  ;;  %v601_v39 = vpop.f32.mrf.mxu3 }
 0x17f   :  { %v602_v5 = vadd.f32 %v601_v39, %v552_v38  ;;  %v714_v40 = vmax.f32 %v666_v37, 0.0  ;;  %v860_v38 = vld [vmem:[%s1511_s6] sm:$0x1] }
 0x180   :  { %v862_v39 = vpack.i.b16 %v860_v38, %v860_v38 }
 0x181   :  { %v726_v41 = vpack.c.bf16 %v714_v40, %v713_v6  ;;  %v629_v42 = vpack.c.bf16 %v602_v5, %v602_v5 }
 0x182   :  { %v864_v40 = vperm.slane %v862_v39, 0 }
 0x183   :  { %818 = vmatmul.bf16.gmra.mxu0 %v726_v41  ;;  %v650_v46 = vunpack.c.l.bf16 %v629_v42 }
 0x184   :  { %v1460_v42 = vunpack.c.l.bf16 %v864_v40 }
 0x185   :  { %v667_v49 = vadd.f32 %v1439_v51, %v650_v46 }
 0x186   :  { %v554_v43 = vpop.f32.mrf.mxu2  ;;  %v603_v44 = vpop.f32.mrf.mxu3 }
 0x187   :  { %v604_v47 = vadd.f32 %v603_v44, %v554_v43  ;;  %v715_v45 = vmax.f32 %v667_v49, 0.0 }
 0x189   :  { %v630_v48 = vpack.c.bf16 %v604_v47, %v604_v47 }
 0x18b   :  { %v651_v52 = vunpack.c.l.bf16 %v630_v48 }
 0x18d   :  { %v668_v53 = vadd.f32 %v1439_v51, %v651_v52 }
 0x18e   :  { %v557_v54 = vpop.f32.mrf.mxu2  ;;  %v606_v57 = vpop.f32.mrf.mxu3 }
 0x18f   :  { %v607_v58 = vadd.f32 %v606_v57, %v557_v54  ;;  %v716_v59 = vmax.f32 %v668_v53, 0.0 }
 0x191   :  { %v727_v60 = vpack.c.bf16 %v716_v59, %v715_v45  ;;  %v631_v61 = vpack.c.bf16 %v607_v58, %v607_v58 }
 0x193   :  { %823 = vmatmul.bf16.gmra.mxu0 %v727_v60  ;;  %v652_v50 = vunpack.c.l.bf16 %v631_v61 }
 0x195   :  { %v669_v2 = vadd.f32 %v1439_v51, %v652_v50 }
 0x196   :  { %v559_v62 = vpop.f32.mrf.mxu2  ;;  %v608_v63 = vpop.f32.mrf.mxu3 }
 0x197   :  { %v609_v0 = vadd.f32 %v608_v63, %v559_v62  ;;  %v717_v10 = vmax.f32 %v669_v2, 0.0 }
 0x199   :  { %v632_v1 = vpack.c.bf16 %v609_v0, %v609_v0 }
 0x19b   :  { %v653_v3 = vunpack.c.l.bf16 %v632_v1 }
 0x19d   :  { %v670_v4 = vadd.f32 %v1439_v51, %v653_v3 }
 0x19e   :  { %v562_v7 = vpop.f32.mrf.mxu2  ;;  %v611_v8 = vpop.f32.mrf.mxu3 }
 0x19f   :  { %v612_v9 = vadd.f32 %v611_v8, %v562_v7  ;;  %v718_v11 = vmax.f32 %v670_v4, 0.0 }
 0x1a1   :  { %v728_v12 = vpack.c.bf16 %v718_v11, %v717_v10  ;;  %v633_v55 = vpack.c.bf16 %v612_v9, %v612_v9 }
 0x1a3   :  { %828 = vmatmul.bf16.gmra.mxu0 %v728_v12  ;;  %v654_v15 = vunpack.c.l.bf16 %v633_v55 }
 0x1a5   :  { %v671_v18 = vadd.f32 %v1439_v51, %v654_v15 }
 0x1a6   :  { %v564_v13 = vpop.f32.mrf.mxu2  ;;  %v613_v14 = vpop.f32.mrf.mxu3 }
 0x1a7   :  { %v614_v16 = vadd.f32 %v613_v14, %v564_v13  ;;  %v719_v23 = vmax.f32 %v671_v18, 0.0 }
 0x1a9   :  { %v634_v17 = vpack.c.bf16 %v614_v16, %v614_v16 }
 0x1ab   :  { %v655_v19 = vunpack.c.l.bf16 %v634_v17 }
 0x1ad   :  { %v672_v56 = vadd.f32 %v1439_v51, %v655_v19 }
 0x1ae   :  { %v567_v20 = vpop.f32.mrf.mxu2  ;;  %v616_v21 = vpop.f32.mrf.mxu3 }
 0x1af   :  { %v617_v22 = vadd.f32 %v616_v21, %v567_v20  ;;  %v720_v24 = vmax.f32 %v672_v56, 0.0 }
 0x1b1   :  { %v729_v25 = vpack.c.bf16 %v720_v24, %v719_v23  ;;  %v635_v26 = vpack.c.bf16 %v617_v22, %v617_v22 }
 0x1b3   :  { %833 = vmatmul.bf16.gmra.mxu0 %v729_v25  ;;  %v656_v29 = vunpack.c.l.bf16 %v635_v26 }
 0x1b5   :  { %v673_v32 = vadd.f32 %v1439_v51, %v656_v29 }
 0x1b6   :  { %v569_v27 = vpop.f32.mrf.mxu2  ;;  %v618_v28 = vpop.f32.mrf.mxu3 }
 0x1b7   :  { %v619_v30 = vadd.f32 %v618_v28, %v569_v27  ;;  %v721_v35 = vmax.f32 %v673_v32, 0.0 }
 0x1b9   :  { %v636_v31 = vpack.c.bf16 %v619_v30, %v619_v30 }
 0x1bb   :  { %v657_v33 = vunpack.c.l.bf16 %v636_v31 }
 0x1bd   :  { %v674_v34 = vadd.f32 %v1439_v51, %v657_v33 }
 0x1bf   :  { %v722_v36 = vmax.f32 %v674_v34, 0.0 }
 0x1c1   :  { %v730_v37 = vpack.c.bf16 %v722_v36, %v721_v35 }
 0x1c3   :  { %838 = vmatmul.bf16.gmra.mxu0 %v730_v37 }
 0x1d0   :  { %v804_v5 = vpop.f32.mrf.mxu0 }
 0x1d1   :  { %v844_v6 = vpack.c.bf16 %v804_v5, %v804_v5 }
 0x1d3   :  { %v865_v41 = vunpack.c.l.bf16 %v844_v6 }
 0x1d5   :  { %v882_v46 = vadd.f32 %v1460_v42, %v865_v41 }
 0x1d7   :  { %v930_v48 = vmax.f32 %v882_v46, 0.0 }
 0x1d8   :  { %v806_v43 = vpop.f32.mrf.mxu0 }
 0x1d9   :  { %v845_v44 = vpack.c.bf16 %v806_v43, %v806_v43 }
 0x1db   :  { %v866_v51 = vunpack.c.l.bf16 %v845_v44 }
 0x1dd   :  { %v883_v47 = vadd.f32 %v1460_v42, %v866_v51 }
 0x1df   :  { %v931_v49 = vmax.f32 %v883_v47, 0.0 }
 0x1e0   :  { %v809_v52 = vpop.f32.mrf.mxu0 }
 0x1e1   :  { %v1464_v53 = vpack.c.bf16 %v931_v49, %v930_v48  ;;  %v846_v54 = vpack.c.bf16 %v809_v52, %v809_v52 }
 0x1e3   :  { %v867_v57 = vunpack.c.l.bf16 %v846_v54 }
 0x1e5   :  { %v884_v59 = vadd.f32 %v1460_v42, %v867_v57 }
 0x1e7   :  { %v932_v62 = vmax.f32 %v884_v59, 0.0 }
 0x1e8   :  { %v811_v58 = vpop.f32.mrf.mxu0 }
 0x1e9   :  { %v847_v45 = vpack.c.bf16 %v811_v58, %v811_v58 }
 0x1eb   :  { %v868_v60 = vunpack.c.l.bf16 %v847_v45 }
 0x1ed   :  { %v885_v61 = vadd.f32 %v1460_v42, %v868_v60 }
 0x1ef   :  { %v933_v63 = vmax.f32 %v885_v61, 0.0 }
 0x1f0   :  { %v814_v50 = vpop.f32.mrf.mxu0 }
 0x1f1   :  { %v1468_v0 = vpack.c.bf16 %v933_v63, %v932_v62  ;;  %v848_v1 = vpack.c.bf16 %v814_v50, %v814_v50 }
 0x1f3   :  { %v869_v2 = vunpack.c.l.bf16 %v848_v1 }
 0x1f5   :  { %v886_v7 = vadd.f32 %v1460_v42, %v869_v2 }
 0x1f7   :  { %v934_v10 = vmax.f32 %v886_v7, 0.0 }
 0x1f8   :  { %v816_v3 = vpop.f32.mrf.mxu0 }
 0x1f9   :  { %v849_v4 = vpack.c.bf16 %v816_v3, %v816_v3 }
 0x1fb   :  { %v870_v8 = vunpack.c.l.bf16 %v849_v4 }
 0x1fd   :  { %v887_v9 = vadd.f32 %v1460_v42, %v870_v8 }
 0x1ff   :  { %v935_v11 = vmax.f32 %v887_v9, 0.0 }
 0x200   :  { %v819_v12 = vpop.f32.mrf.mxu0 }
 0x201   :  { %v1472_v55 = vpack.c.bf16 %v935_v11, %v934_v10  ;;  %v850_v13 = vpack.c.bf16 %v819_v12, %v819_v12  ;;  %v14_v12 = vstv %s1512_s8 }
 0x202   :  { %15 = vst [vmem:[#allocation2] sm:$0x1] %v14_v12 }
 0x203   :  { %v871_v14 = vunpack.c.l.bf16 %v850_v13  ;;  %v966_v13 = vsel %vm955_vm1, %v1472_v55, 0 }
 0x205   :  { %v888_v17 = vadd.f32 %v1460_v42, %v871_v14 }
 0x207   :  { %v936_v56 = vmax.f32 %v888_v17, 0.0  ;;  %v954_v17 = vld [vmem:[%s1513_s7] sm:$0xf] }
 0x208   :  { %v821_v15 = vpop.f32.mrf.mxu0 }
 0x209   :  { %v851_v16 = vpack.c.bf16 %v821_v15, %v821_v15  ;;  %v996_v14 = vld [vmem:[#allocation2] sm:$0x1]  ;;  %v963_v15 = vsel %vm955_vm1, %v1468_v0, 0 }
 0x20b   :  { %v872_v18 = vunpack.c.l.bf16 %v851_v16  ;;  %v960_v16 = vsel %vm955_vm1, %v1464_v53, 0 }
 0x20d   :  { %v889_v19 = vadd.f32 %v1460_v42, %v872_v18 }
 0x20f   :  { %v937_v20 = vmax.f32 %v889_v19, 0.0 }
 0x210   :  { %v824_v21 = vpop.f32.mrf.mxu0 }
 0x211   :  { %v949_v22 = vpack.c.bf16 %v937_v20, %v936_v56  ;;  %v852_v23 = vpack.c.bf16 %v824_v21, %v824_v21 }
 0x213   :  { %v873_v24 = vunpack.c.l.bf16 %v852_v23  ;;  %v969_v11 = vsel %vm955_vm1, %v949_v22, 0 }
 0x215   :  { %v890_v27 = vadd.f32 %v1460_v42, %v873_v24 }
 0x217   :  { %v938_v30 = vmax.f32 %v890_v27, 0.0 }
 0x218   :  { %v826_v25 = vpop.f32.mrf.mxu0 }
 0x219   :  { %v853_v26 = vpack.c.bf16 %v826_v25, %v826_v25 }
 0x21b   :  { %v874_v28 = vunpack.c.l.bf16 %v853_v26 }
 0x21d   :  { %v891_v29 = vadd.f32 %v1460_v42, %v874_v28 }
 0x21f   :  { %v939_v31 = vmax.f32 %v891_v29, 0.0 }
 0x220   :  { %v829_v32 = vpop.f32.mrf.mxu0 }
 0x221   :  { %v950_v33 = vpack.c.bf16 %v939_v31, %v938_v30  ;;  %v854_v57 = vpack.c.bf16 %v829_v32, %v829_v32 }
 0x223   :  { %v875_v62 = vunpack.c.l.bf16 %v854_v57  ;;  %v972_v10 = vsel %vm955_vm1, %v950_v33, 0 }
 0x225   :  { %v892_v2 = vadd.f32 %v1460_v42, %v875_v62 }
 0x227   :  { %v940_v7 = vmax.f32 %v892_v2, 0.0 }
 0x228   :  { %v831_v34 = vpop.f32.mrf.mxu0 }
 0x229   :  { %v855_v48 = vpack.c.bf16 %v831_v34, %v831_v34 }
 0x22b   :  { %v876_v59 = vunpack.c.l.bf16 %v855_v48 }
 0x22d   :  { %v893_v50 = vadd.f32 %v1460_v42, %v876_v59 }
 0x22f   :  { %v941_v3 = vmax.f32 %v893_v50, 0.0 }
 0x230   :  { %v834_v35 = vpop.f32.mrf.mxu0 }
 0x231   :  { %v856_v40 = vpack.c.bf16 %v834_v35, %v834_v35  ;;  %v951_v8 = vpack.c.bf16 %v941_v3, %v940_v7 }
 0x233   :  { %v877_v51 = vunpack.c.l.bf16 %v856_v40  ;;  %v975_v9 = vsel %vm955_vm1, %v951_v8, 0 }
 0x235   :  { %v894_v58 = vadd.f32 %v1460_v42, %v877_v51 }
 0x237   :  { %v942_v63 = vmax.f32 %v894_v58, 0.0 }
 0x238   :  { %v836_v36 = vpop.f32.mrf.mxu0 }
 0x239   :  { %v857_v39 = vpack.c.bf16 %v836_v36, %v836_v36 }
 0x23b   :  { %v878_v43 = vunpack.c.l.bf16 %v857_v39 }
 0x23d   :  { %v895_v49 = vadd.f32 %v1460_v42, %v878_v43 }
 0x23f   :  { %v943_v60 = vmax.f32 %v895_v49, 0.0 }
 0x240   :  { %v839_v37 = vpop.f32.mrf.mxu0 }
 0x241   :  { %v858_v38 = vpack.c.bf16 %v839_v37, %v839_v37  ;;  %v952_v1 = vpack.c.bf16 %v943_v60, %v942_v63 }
 0x243   :  { %v879_v5 = vunpack.c.l.bf16 %v858_v38  ;;  %v978_v4 = vsel %vm955_vm1, %v952_v1, 0 }
 0x245   :  { %v896_v44 = vadd.f32 %v1460_v42, %v879_v5 }
 0x247   :  { %v944_v52 = vmax.f32 %v896_v44, 0.0 }
 0x248   :  { %v841_v6 = vpop.f32.mrf.mxu0 }
 0x249   :  { %v859_v41 = vpack.c.bf16 %v841_v6, %v841_v6 }
 0x24b   :  { %v880_v46 = vunpack.c.l.bf16 %v859_v41 }
 0x24d   :  { %v897_v47 = vadd.f32 %v1460_v42, %v880_v46  ;;  %v1174_v42 = vmov 0  }
 0x24e   :  { %1173 = vset.pattern.permute.xlu0 %v1174_v42 }
 0x24f   :  { %v945_v54 = vmax.f32 %v897_v47, 0.0  ;;  %999 = vperm.xlu0 %1173, %v996_v14  }
 0x251   :  { %v953_v45 = vpack.c.bf16 %v945_v54, %v944_v52 }
 0x253   :  { %v981_v61 = vsel %vm955_vm1, %v953_v45, 0 }
 0x254   :  { %983 = vmatpush.bf16.xpose.msra.mxu1 %v981_v61 }
 0x25c   :  { %984 = vmatpush.bf16.xpose.msra.mxu1 %v978_v4 }
 0x264   :  { %985 = vmatpush.bf16.xpose.msra.mxu1 %v975_v9 }
 0x26c   :  { %986 = vmatpush.bf16.xpose.msra.mxu1 %v972_v10 }
 0x274   :  { %987 = vmatpush.bf16.xpose.msra.mxu1 %v969_v11 }
 0x27c   :  { %988 = vmatpush.bf16.xpose.msra.mxu1 %v966_v13 }
 0x284   :  { %989 = vmatpush.bf16.xpose.msra.mxu1 %v963_v15 }
 0x28c   :  { %990 = vmatpush.bf16.xpose.msra.mxu1 %v960_v16 }
 0x293   :  { %1137 = vmatmul.msk.bf16.vlgmr.msra.gmra.mxu1 %vm955_vm1, %v954_v17 }
 0x2c1   :  { %v1000_v18 = vpop.permute.xlu0 %999 }
 0x2c2   :  { %v1002_v19 = vperm.slane %v1000_v18, 0 }
 0x310   :  { %v992_v55 = vpop.f32.mrf.mxu1 }
 0x311   :  { %v1003_v56 = vadd.f32 %v1002_v19, %v992_v55 }
 0x313   :  { %1004 = vst [vmem:[%s1514_s9] sm:$0x1] %v1003_v56 }
 0x318   :  { %v994_v0 = vpop.f32.mrf.mxu1 }

</bundles_post_ra>
